<compile_context>
chip_gen: v6e
topology: v6e:2x2x1
jax: 0.10.0
libtpu: 0.0.40
codegen_flags: <defaults>
</compile_context>

<pallas_src>
from functools import partial

import jax
import jax.numpy as jnp
from jax.experimental import pallas as pl
from jax.experimental.pallas import tpu as pltpu

_TM_DEFAULT = 2048          # row tile (accumulator / output block height)
_TK_DEFAULT = 2048          # reduction tile (A tile width)
_XW_RESIDENT_MAX_BYTES = 4 << 20   # keep XW fully in VMEM up to this size


def _round_up(x, m):
    return (x + m - 1) // m * m


def _clamp_tiles(n, tm, tk):
    lim = _round_up(n, 128)
    return min(tm, lim), min(tk, lim)


def prepare_adjacency(adjacency_matrix, *, tm=_TM_DEFAULT, tk=_TK_DEFAULT,
                      dtype=jnp.int8):
    """One-time per graph: quantize + pad the adjacency to tile multiples.

    Binary (0/1) adjacency -> int8 is lossless and halves HBM traffic vs bf16.
    For weighted (non-integer) adjacency pass dtype=jnp.bfloat16.
    Doing this once outside `simple_gnn_forward` avoids re-reading/re-writing
    the O(N^2) array on every forward call.
    """
    n = adjacency_matrix.shape[0]
    tm, tk = _clamp_tiles(n, tm, tk)
    n_pad_m = _round_up(n, tm)
    n_pad_k = _round_up(n, tk)
    a = adjacency_matrix.astype(dtype)
    return jnp.pad(a, ((0, n_pad_m - n), (0, n_pad_k - n)))


def _agg_kernel(a_ref, xw_ref, b_ref, o_ref, acc_ref, *, tk, xw_resident):
    """out = relu(A @ XW + b), tiled over (row, reduction) with f32 acc."""
    k = pl.program_id(1)

    @pl.when(k == 0)
    def _init():
        # Fold the bias into the accumulator init (no epilogue add/broadcast).
        acc_ref[...] = jnp.broadcast_to(b_ref[...], acc_ref.shape)

    # A is streamed as int8 (or bf16) from HBM; upcast to bf16 for the MXU.
    a = a_ref[...].astype(jnp.bfloat16)

    if xw_resident:
        # XW lives fully in VMEM; slice the current reduction chunk.
        off = pl.multiple_of(k * tk, 128)
        xw = xw_ref[pl.ds(off, tk), :]
    else:
        xw = xw_ref[...]

    acc_ref[...] += jnp.dot(a, xw, preferred_element_type=jnp.float32)

    @pl.when(k == pl.num_programs(1) - 1)
    def _epilogue():
        o_ref[...] = jnp.maximum(acc_ref[...], 0.0).astype(o_ref.dtype)


def simple_gnn_forward(node_features, adjacency, weight, bias, *,
                       tm=_TM_DEFAULT, tk=_TK_DEFAULT,
                       xw_dtype=jnp.bfloat16, out_dtype=jnp.float32):
    """node_features: [N, D_in]; adjacency: raw [N, N] OR the padded int8/bf16
    array returned by prepare_adjacency (preferred — cached per graph);
    weight: [H, D_in] (torch nn.Linear convention); bias: [H] -> [N, H]."""
    n, d_in = node_features.shape
    h = weight.shape[0]

    h_pad = _round_up(h, 128)                 # lane-dense output / MXU RHS
    tm, tk = _clamp_tiles(n, tm, tk)
    n_pad_m = _round_up(n, tm)                # padded rows of A / output
    n_pad_k = _round_up(n, tk)                # padded cols of A / rows of XW

    f32 = jnp.float32
    x = node_features.astype(f32)
    w_t = weight.astype(f32).T                # [D_in, H]
    b = bias.astype(f32)

    # Adjacency: use the pre-prepared padded array if given (no per-call
    # HBM round trip on the dominant O(N^2) operand), else convert now.
    if adjacency.shape == (n_pad_m, n_pad_k) and adjacency.shape != (n, n):
        a_p = adjacency
    elif adjacency.shape == (n, n) and adjacency.dtype in (jnp.int8, jnp.bfloat16):
        a_p = jnp.pad(adjacency, ((0, n_pad_m - n), (0, n_pad_k - n)))
    else:
        a_p = prepare_adjacency(adjacency, tm=tm, tk=tk)

    # Tiny O(N*D_in*H) prologue in plain XLA: XW = X @ W^T, padded, bf16.
    xw = jnp.dot(x, w_t, preferred_element_type=f32)
    xw_p = jnp.pad(xw, ((0, n_pad_k - n), (0, h_pad - h))).astype(xw_dtype)
    b_p = jnp.pad(b, (0, h_pad - h)).reshape(1, h_pad)

    # Keep XW fully VMEM-resident when small; otherwise stream per k-tile.
    xw_bytes = n_pad_k * h_pad * jnp.dtype(xw_dtype).itemsize
    xw_resident = xw_bytes <= _XW_RESIDENT_MAX_BYTES
    if xw_resident:
        xw_spec = pl.BlockSpec((n_pad_k, h_pad), lambda i, k: (0, 0))
    else:
        xw_spec = pl.BlockSpec((tk, h_pad), lambda i, k: (k, 0))

    kernel = partial(_agg_kernel, tk=tk, xw_resident=xw_resident)

    out_p = pl.pallas_call(
        kernel,
        out_shape=jax.ShapeDtypeStruct((n_pad_m, h_pad), out_dtype),
        grid=(n_pad_m // tm, n_pad_k // tk),
        in_specs=[
            pl.BlockSpec((tm, tk), lambda i, k: (i, k)),      # A tile (int8)
            xw_spec,                                          # XW (bf16)
            pl.BlockSpec((1, h_pad), lambda i, k: (0, 0)),    # bias
        ],
        out_specs=pl.BlockSpec((tm, h_pad), lambda i, k: (i, 0)),
        scratch_shapes=[pltpu.VMEM((tm, h_pad), f32)],
        compiler_params=pltpu.CompilerParams(
            dimension_semantics=("parallel", "arbitrary"),
            vmem_limit_bytes=32 << 20,   # lifts v5e's 16 MiB scoped default
        ),
    )(a_p, xw_p, b_p)

    return out_p[:n, :h]


if __name__ == "__main__":
    # Small shapes consistent with the module: N nodes, input_dim, hidden_dim.
    N, INPUT_DIM, HIDDEN_DIM = 8, 16, 32

    key = jax.random.PRNGKey(0)
    k_x, k_a, k_w, k_b = jax.random.split(key, 4)

    node_features = jax.random.normal(k_x, (N, INPUT_DIM), dtype=jnp.float32)
    adjacency_matrix = (
        jax.random.uniform(k_a, (N, N), dtype=jnp.float32) > 0.5
    ).astype(jnp.float32)

    # Deterministic nn.Linear-style init: U(-1/sqrt(in), 1/sqrt(in))
    bound = 1.0 / (INPUT_DIM ** 0.5)
    weight = jax.random.uniform(
        k_w, (HIDDEN_DIM, INPUT_DIM), minval=-bound, maxval=bound, dtype=jnp.float32
    )
    bias = jax.random.uniform(
        k_b, (HIDDEN_DIM,), minval=-bound, maxval=bound, dtype=jnp.float32
    )

    # One-time per graph: int8-quantize + pad the binary adjacency so the
    # per-forward kernel streams 1 byte/edge with no extra HBM round trip.
    adj_prepared = prepare_adjacency(adjacency_matrix)

    out = simple_gnn_forward(node_features, adj_prepared, weight, bias)
    out = jax.block_until_ready(out)

    # Reference in plain f32 JAX (kernel uses bf16 MXU inputs with f32
    # accumulation, so compare at bf16-level tolerance).
    ref = jnp.maximum(adjacency_matrix @ node_features @ weight.T + bias, 0.0)
    assert out.shape == (N, HIDDEN_DIM)
    assert jnp.allclose(out, ref, atol=5e-2, rtol=5e-2)

    print("KERNEL_OK")
</pallas_src>

<mosaic_0001>
module attributes {stable_mosaic.version = 11 : i64} {
  func.func @_agg_kernel(%arg0: i32, %arg1: i32, %arg2: memref<128x128xi8, #tpu.memory_space<vmem>>, %arg3: memref<128x128xbf16, #tpu.memory_space<vmem>>, %arg4: memref<1x128xf32, #tpu.memory_space<vmem>>, %arg5: memref<128x128xf32, #tpu.memory_space<vmem>>, %arg6: memref<128x128xf32, #tpu.memory_space<vmem>>) attributes {dimension_semantics = [#tpu.dimension_semantics<parallel>, #tpu.dimension_semantics<arbitrary>], iteration_bounds = array<i64: 1, 1>, scalar_prefetch = 0 : i64, scratch_operands = 1 : i64, tpu.core_type = #tpu.core_type<tc>, window_params = [{transform_indices = @transform_0, window_bounds = array<i64: 128, 128>}, {pipeline_mode = #tpu.pipeline_mode<synchronous>, transform_indices = @transform_1, window_bounds = array<i64: 128, 128>}, {pipeline_mode = #tpu.pipeline_mode<synchronous>, transform_indices = @transform_2, window_bounds = array<i64: 1, 128>}, {transform_indices = @transform_3, window_bounds = array<i64: 128, 128>}]} {
    %c0_i32 = arith.constant 0 : i32
    %0 = arith.cmpi eq, %arg1, %c0_i32 : i32
    %1 = arith.extui %0 : i1 to i32
    %c0_i32_0 = arith.constant 0 : i32
    %2 = arith.cmpi ne, %1, %c0_i32_0 : i32
    scf.if %2 {
      %c0_9 = arith.constant 0 : index
      %c0_10 = arith.constant 0 : index
      %16 = vector.load %arg4[%c0_9, %c0_10] : memref<1x128xf32, #tpu.memory_space<vmem>>, vector<1x128xf32>
      %17 = vector.shape_cast %16 : vector<1x128xf32> to vector<1x128xf32>
      %18 = vector.broadcast %17 : vector<1x128xf32> to vector<128x128xf32>
      %c0_11 = arith.constant 0 : index
      %c0_12 = arith.constant 0 : index
      %19 = vector.load %arg6[%c0_11, %c0_12] : memref<128x128xf32, #tpu.memory_space<vmem>>, vector<128x128xf32>
      tpu.vector_store %arg6[%c0_11, %c0_12], %18 {strides = array<i32>} : memref<128x128xf32, #tpu.memory_space<vmem>>, vector<128x128xf32>,
    } else {
    }
    %c0 = arith.constant 0 : index
    %c0_1 = arith.constant 0 : index
    %3 = vector.load %arg2[%c0, %c0_1] : memref<128x128xi8, #tpu.memory_space<vmem>>, vector<128x128xi8>
    %4 = arith.sitofp %3 : vector<128x128xi8> to vector<128x128xbf16>
    %c128_i32 = arith.constant 128 : i32
    %5 = arith.muli %arg1, %c128_i32 : i32
    %6 = tpu.assume_multiple %5, 128 : i32
    %7 = arith.index_cast %6 : i32 to index
    %c0_2 = arith.constant 0 : index
    %8 = vector.load %arg3[%7, %c0_2] : memref<128x128xbf16, #tpu.memory_space<vmem>>, vector<128x128xbf16>
    %c0_3 = arith.constant 0 : index
    %c0_4 = arith.constant 0 : index
    %9 = vector.load %arg6[%c0_3, %c0_4] : memref<128x128xf32, #tpu.memory_space<vmem>>, vector<128x128xf32>
    %cst = arith.constant dense<0.000000e+00> : vector<128x128xf32>
    %10 = tpu.matmul %4, %8, %cst {dimension_numbers = #tpu.dot_dimension_numbers<[1], [0], [0], [1], [0, 0, 1, 1], [], []>} : vector<128x128xbf16>, vector<128x128xbf16>, vector<128x128xf32> -> vector<128x128xf32>
    %11 = arith.addf %9, %10 : vector<128x128xf32>
    %c0_5 = arith.constant 0 : index
    %c0_6 = arith.constant 0 : index
    %12 = vector.load %arg6[%c0_5, %c0_6] : memref<128x128xf32, #tpu.memory_space<vmem>>, vector<128x128xf32>
    tpu.vector_store %arg6[%c0_5, %c0_6], %11 {strides = array<i32>} : memref<128x128xf32, #tpu.memory_space<vmem>>, vector<128x128xf32>,
    %c0_i32_7 = arith.constant 0 : i32
    %13 = arith.cmpi eq, %arg1, %c0_i32_7 : i32
    %14 = arith.extui %13 : i1 to i32
    %c0_i32_8 = arith.constant 0 : i32
    %15 = arith.cmpi ne, %14, %c0_i32_8 : i32
    scf.if %15 {
      %c0_9 = arith.constant 0 : index
      %c0_10 = arith.constant 0 : index
      %16 = vector.load %arg6[%c0_9, %c0_10] : memref<128x128xf32, #tpu.memory_space<vmem>>, vector<128x128xf32>
      %cst_11 = arith.constant 0.000000e+00 : f32
      %17 = vector.broadcast %cst_11 : f32 to vector<128x128xf32>
      %18 = arith.maximumf %16, %17 : vector<128x128xf32>
      %c0_12 = arith.constant 0 : index
      %c0_13 = arith.constant 0 : index
      %19 = vector.load %arg5[%c0_12, %c0_13] : memref<128x128xf32, #tpu.memory_space<vmem>>, vector<128x128xf32>
      tpu.vector_store %arg5[%c0_12, %c0_13], %18 {strides = array<i32>} : memref<128x128xf32, #tpu.memory_space<vmem>>, vector<128x128xf32>,
    } else {
    }
    return
  }
  func.func @transform_0(%arg0: i32, %arg1: i32) -> (i32, i32) {
    %c0_i32 = arith.constant 0 : i32
    return %arg0, %arg1 : i32, i32
  }
  func.func @transform_1(%arg0: i32, %arg1: i32) -> (i32, i32) {
    %c0_i32 = arith.constant 0 : i32
    %c0_i32_0 = arith.constant 0 : i32
    %c0_i32_1 = arith.constant 0 : i32
    return %c0_i32, %c0_i32_0 : i32, i32
  }
  func.func @transform_2(%arg0: i32, %arg1: i32) -> (i32, i32) {
    %c0_i32 = arith.constant 0 : i32
    %c0_i32_0 = arith.constant 0 : i32
    %c0_i32_1 = arith.constant 0 : i32
    return %c0_i32, %c0_i32_0 : i32, i32
  }
  func.func @transform_3(%arg0: i32, %arg1: i32) -> (i32, i32) {
    %c0_i32 = arith.constant 0 : i32
    %c0_i32_0 = arith.constant 0 : i32
    return %arg0, %c0_i32 : i32, i32
  }
}

</mosaic_0001>

<bundles_post_ra>
// kernel: tpu_custom_call.1
= control target key start
LH: loop header
LB: loop body
LE: loop exit
PB: predicated region body
PF: predicated region fallthrough
CT: control target
= control target key end

     0   :  { %8 = vsyncpa [#allocation4], 0  ;;  %s567_s0 = inlined_call_operand.hbm [shape: s8[128,128], index: 0, kind: input, shape index: {}]   ;;  %s568_s1 = inlined_call_operand.hbm [shape: bf16[128,128], index: 1, kind: input, shape index: {}]   ;;  %s569_s2 = inlined_call_operand.vmem [shape: f32[1,128], index: 2, kind: input, shape index: {}]   ;;  %s570_s3 = inlined_call_operand.hbm [shape: f32[128,128], index: 3, kind: output, shape index: {}]  }
   0x1   :  { %9 = vsyncpa [#allocation7], 0 }
   0x2   :  { %10 = vsyncpa [#allocation5], 0  ;;  %s522_s12 = smov [#allocation3]  }
   0x3   :  { %s16_s13 = sshll.u32 %s522_s12, 4  ;;  %s17_s13 = int_to_ptr.vmem [resolvable:$true] %s16_s13 }
   0x4   :  { %s464_s14 = scalar_lea.vmem %s17_s13, 512  ;;  %p469_p1 = scmp.lt.s32.totalorder %s17_s13, %s17_s13 }
   0x5   :  { %p465_p0 = scmp.ne.s32.totalorder %s17_s13, %s464_s14  ;;  %p470_p2 = scmp.lt.s32.totalorder %s464_s14, %s464_s14 }
   0x7   :  { %p471_p3 = por %p470_p2, %p469_p1 }
   0x9   :  { %p472_p4 = pnand %p471_p3, %p465_p0 }
   0xb   :  { %475 = shalt.err (!%p472_p4)
}
   0xc   :  { %s523_s15 = smov 128   ;;  %s524_s16 = smov 8  }
   0xd   :  { %22 = dma.hbm_to_vmem [thread:$0]  %s567_s0, 512, %s17_s13, [#allocation4], %s523_s15, %s523_s15, %s524_s16  }
   0xe   :  { %s525_s19 = smov [#allocation6]  }
   0xf   :  { %s28_s20 = sshll.u32 %s525_s19, 4  ;;  %s29_s20 = int_to_ptr.vmem [resolvable:$true] %s28_s20 }
  0x10   :  { %s484_s21 = scalar_lea.vmem %s29_s20, 1024  ;;  %p489_p6 = scmp.lt.s32.totalorder %s29_s20, %s29_s20 }
  0x11   :  { %p485_p5 = scmp.ne.s32.totalorder %s29_s20, %s484_s21  ;;  %p490_p7 = scmp.lt.s32.totalorder %s484_s21, %s484_s21 }
  0x13   :  { %p491_p8 = por %p490_p7, %p489_p6 }
  0x15   :  { %p492_p9 = pnand %p491_p8, %p485_p5 }
  0x17   :  { %495 = shalt.err (!%p492_p9)
}
  0x18   :  { %s526_s22 = smov 64   ;;  %s527_s23 = smov 4  }
  0x19   :  { %34 = dma.hbm_to_vmem [thread:$0]  %s568_s1, 1024, %s29_s20, [#allocation7], %s526_s22, %s526_s22, %s527_s23  }
  0x1a   :  { %516 = dma.done.wait [#allocation4], 512  }
  0x1b   :  { %517 = vsyncadd [#allocation4], 4294966784 }
  0x1c   :  { %518 = dma.done.wait [#allocation7], 1024  }
  0x1d   :  { %519 = vsyncadd [#allocation7], 4294966272  ;;  %v448_v0 = vld [vmem:[#allocation6 + $0x38] sm:$0xff]   ;;  %v449_v1 = vld [vmem:[#allocation6 + $0x30] sm:$0xff]  }
  0x1e   :  { %393 = vmatprep.subr.bf16.mxu0 %v448_v0  ;;  %425 = vmatprep.subr.bf16.mxu1 %v448_v0  ;;  %v450_v2 = vld [vmem:[#allocation6 + $0x28] sm:$0xff]   ;;  %v451_v3 = vld [vmem:[#allocation6 + $0x20] sm:$0xff]   ;;  %v73_v5 = vld [vmem:[#allocation3 + $0x10] sm:$0xff] }
  0x1f   :  { %394 = vmatpush3.bf16.msra.mxu0 %v448_v0  ;;  %433 = vmatpush3.bf16.msra.mxu1 %v448_v0  ;;  %v71_v4 = vld [vmem:[#allocation3] sm:$0xff]  ;;  %v79_v7 = vunpack.c.l.s8.bf16 %v73_v5  ;;  %v452_v8 = vld [vmem:[#allocation6 + $0x18] sm:$0xff]   ;;  %v453_v9 = vld [vmem:[#allocation6 + $0x10] sm:$0xff]   ;;  %v80_v15 = vunpack.c.h.s8.bf16 %v73_v5 }
  0x20   :  { %395 = vmatprep.subr.bf16.mxu0 %v449_v1  ;;  %426 = vmatprep.subr.bf16.mxu1 %v449_v1  ;;  %v75_v6 = vunpack.c.l.s8.bf16 %v71_v4  ;;  %v454_v10 = vld [vmem:[#allocation6 + $0x8] sm:$0xff]   ;;  %v455_v11 = vld [vmem:[#allocation6] sm:$0xff]   ;;  %v74_v13 = vld [vmem:[#allocation3 + $0x18] sm:$0xff]  ;;  %v76_v14 = vunpack.c.h.s8.bf16 %v71_v4 }
  0x21   :  { %417 = vmatprep.mubr.bf16.mxu1 %v79_v7  ;;  %v72_v12 = vld [vmem:[#allocation3 + $0x8] sm:$0xff]  ;;  %v81_v17 = vunpack.c.l.s8.bf16 %v74_v13  ;;  %v82_v19 = vunpack.c.h.s8.bf16 %v74_v13  ;;  %v368_v20 = vld [vmem:[%s569_s2] ss:$0 sm:$0xff]  ;;  %s528_s2 = smov [#allocation8]  }
  0x22   :  { %409 = vmatprep.mubr.bf16.mxu0 %v75_v6  ;;  %v77_v16 = vunpack.c.l.s8.bf16 %v72_v12  ;;  %v78_v18 = vunpack.c.h.s8.bf16 %v72_v12  ;;  %s353_s26 = sshll.u32 %s528_s2, 4  ;;  %s354_s26 = int_to_ptr.vmem [resolvable:$true] %s353_s26 }
  0x23   :  { %396 = vmatpush3.bf16.msra.mxu0 %v449_v1  ;;  %434 = vmatpush3.bf16.msra.mxu1 %v449_v1  ;;  %s496_s27 = scalar_lea.vmem %s354_s26, 2048  ;;  %p501_p11 = scmp.lt.s32.totalorder %s354_s26, %s354_s26 }
  0x24   :  { %397 = vmatprep.subr.bf16.mxu0 %v450_v2  ;;  %427 = vmatprep.subr.bf16.mxu1 %v450_v2  ;;  %p497_p10 = scmp.ne.s32.totalorder %s354_s26, %s496_s27  ;;  %p502_p12 = scmp.lt.s32.totalorder %s496_s27, %s496_s27 }
  0x26   :  { %p503_p13 = por %p502_p12, %p501_p11 }
  0x27   :  { %398 = vmatpush3.bf16.msra.mxu0 %v450_v2  ;;  %435 = vmatpush3.bf16.msra.mxu1 %v450_v2 }
  0x28   :  { %399 = vmatprep.subr.bf16.mxu0 %v451_v3  ;;  %428 = vmatprep.subr.bf16.mxu1 %v451_v3  ;;  %p504_p0 = pnand %p503_p13, %p497_p10 }
  0x2b   :  { %400 = vmatpush3.bf16.msra.mxu0 %v451_v3  ;;  %436 = vmatpush3.bf16.msra.mxu1 %v451_v3 }
  0x2c   :  { %401 = vmatprep.subr.bf16.mxu0 %v452_v8  ;;  %429 = vmatprep.subr.bf16.mxu1 %v452_v8 }
  0x2f   :  { %402 = vmatpush3.bf16.msra.mxu0 %v452_v8  ;;  %437 = vmatpush3.bf16.msra.mxu1 %v452_v8 }
  0x30   :  { %403 = vmatprep.subr.bf16.mxu0 %v453_v9  ;;  %430 = vmatprep.subr.bf16.mxu1 %v453_v9 }
  0x33   :  { %404 = vmatpush3.bf16.msra.mxu0 %v453_v9  ;;  %438 = vmatpush3.bf16.msra.mxu1 %v453_v9 }
  0x34   :  { %405 = vmatprep.subr.bf16.mxu0 %v454_v10  ;;  %431 = vmatprep.subr.bf16.mxu1 %v454_v10 }
  0x37   :  { %406 = vmatpush3.bf16.msra.mxu0 %v454_v10  ;;  %439 = vmatpush3.bf16.msra.mxu1 %v454_v10 }
  0x38   :  { %407 = vmatprep.subr.bf16.mxu0 %v455_v11  ;;  %432 = vmatprep.subr.bf16.mxu1 %v455_v11 }
  0x3b   :  { %408 = vmatpush3.bf16.msra.mxu0 %v455_v11  ;;  %440 = vmatpush3.bf16.msra.mxu1 %v455_v11 }
  0x3e   :  { %410 = vmatmul.mubr.bf16.vlgmr.msra.gmra.mxu0 %v76_v14  ;;  %418 = vmatmul.mubr.bf16.vlgmr.msra.gmra.mxu1 %v80_v15 }
  0x3f   :  { %413 = vmatprep.mubr.bf16.mxu0 %v77_v16  ;;  %421 = vmatprep.mubr.bf16.mxu1 %v81_v17 }
  0x46   :  { %414 = vmatmul.mubr.bf16.gmra.mxu0 %v78_v18  ;;  %422 = vmatmul.mubr.bf16.gmra.mxu1 %v82_v19 }
  0xfe   :  { %v411_v21 = vpop.f32.mrf.mxu0  ;;  %v419_v22 = vpop.f32.mrf.mxu1 }
  0xff   :  { %v267_v23 = vadd.f32 %v411_v21, %v368_v20  ;;  %v275_v24 = vadd.f32 %v419_v22, %v368_v20 }
 0x100   :  { %v202_v25 = vpop.f32.mrf.mxu0  ;;  %v234_v26 = vpop.f32.mrf.mxu1 }
 0x101   :  { %v318_v27 = vmax.f32 %v267_v23, 0.0  ;;  %v326_v28 = vmax.f32 %v275_v24, 0.0  ;;  %v265_v29 = vadd.f32 %v368_v20, %v202_v25  ;;  %v273_v30 = vadd.f32 %v368_v20, %v234_v26 }
 0x102   :  { %v412_v31 = vpop.f32.mrf.mxu0  ;;  %v420_v32 = vpop.f32.mrf.mxu1 }
 0x103   :  { %334 = vst [vmem:[#allocation8 + $0x10] sm:$0xff] %v318_v27  ;;  %342 = vst [vmem:[#allocation8 + $0x50] sm:$0xff] %v326_v28  ;;  %v316_v33 = vmax.f32 %v265_v29, 0.0  ;;  %v324_v34 = vmax.f32 %v273_v30, 0.0  ;;  %v268_v35 = vadd.f32 %v412_v31, %v368_v20  ;;  %v276_v36 = vadd.f32 %v420_v32, %v368_v20 }
 0x104   :  { %v205_v37 = vpop.f32.mrf.mxu0  ;;  %v237_v38 = vpop.f32.mrf.mxu1 }
 0x105   :  { %332 = vst [vmem:[#allocation8] sm:$0xff] %v316_v33  ;;  %340 = vst [vmem:[#allocation8 + $0x40] sm:$0xff] %v324_v34  ;;  %v319_v39 = vmax.f32 %v268_v35, 0.0  ;;  %v327_v40 = vmax.f32 %v276_v36, 0.0  ;;  %v266_v41 = vadd.f32 %v368_v20, %v205_v37  ;;  %v274_v42 = vadd.f32 %v368_v20, %v237_v38 }
 0x106   :  { %v415_v43 = vpop.f32.mrf.mxu0  ;;  %v423_v44 = vpop.f32.mrf.mxu1 }
 0x107   :  { %335 = vst [vmem:[#allocation8 + $0x18] sm:$0xff] %v319_v39  ;;  %343 = vst [vmem:[#allocation8 + $0x58] sm:$0xff] %v327_v40  ;;  %v317_v45 = vmax.f32 %v266_v41, 0.0  ;;  %v325_v46 = vmax.f32 %v274_v42, 0.0  ;;  %v271_v47 = vadd.f32 %v415_v43, %v368_v20  ;;  %v279_v48 = vadd.f32 %v423_v44, %v368_v20 }
 0x108   :  { %v218_v49 = vpop.f32.mrf.mxu0  ;;  %v250_v50 = vpop.f32.mrf.mxu1 }
 0x109   :  { %333 = vst [vmem:[#allocation8 + $0x8] sm:$0xff] %v317_v45  ;;  %341 = vst [vmem:[#allocation8 + $0x48] sm:$0xff] %v325_v46  ;;  %v322_v51 = vmax.f32 %v271_v47, 0.0  ;;  %v330_v52 = vmax.f32 %v279_v48, 0.0  ;;  %v269_v53 = vadd.f32 %v368_v20, %v218_v49  ;;  %v277_v54 = vadd.f32 %v368_v20, %v250_v50 }
 0x10a   :  { %v416_v55 = vpop.f32.mrf.mxu0  ;;  %v424_v56 = vpop.f32.mrf.mxu1 }
 0x10b   :  { %338 = vst [vmem:[#allocation8 + $0x30] sm:$0xff] %v322_v51  ;;  %346 = vst [vmem:[#allocation8 + $0x70] sm:$0xff] %v330_v52  ;;  %v320_v57 = vmax.f32 %v269_v53, 0.0  ;;  %v328_v58 = vmax.f32 %v277_v54, 0.0  ;;  %v272_v59 = vadd.f32 %v416_v55, %v368_v20  ;;  %v280_v60 = vadd.f32 %v424_v56, %v368_v20 }
 0x10c   :  { %v221_v61 = vpop.f32.mrf.mxu0  ;;  %v253_v62 = vpop.f32.mrf.mxu1 }
 0x10d   :  { %336 = vst [vmem:[#allocation8 + $0x20] sm:$0xff] %v320_v57  ;;  %344 = vst [vmem:[#allocation8 + $0x60] sm:$0xff] %v328_v58  ;;  %v323_v63 = vmax.f32 %v272_v59, 0.0  ;;  %v331_v0 = vmax.f32 %v280_v60, 0.0  ;;  %v270_v1 = vadd.f32 %v368_v20, %v221_v61  ;;  %v278_v2 = vadd.f32 %v368_v20, %v253_v62 }
 0x10f   :  { %339 = vst [vmem:[#allocation8 + $0x38] sm:$0xff] %v323_v63  ;;  %347 = vst [vmem:[#allocation8 + $0x78] sm:$0xff] %v331_v0  ;;  %v321_v3 = vmax.f32 %v270_v1, 0.0  ;;  %v329_v4 = vmax.f32 %v278_v2, 0.0 }
 0x111   :  { %337 = vst [vmem:[#allocation8 + $0x28] sm:$0xff] %v321_v3  ;;  %345 = vst [vmem:[#allocation8 + $0x68] sm:$0xff] %v329_v4 }
 0x112   :  { %507 = shalt.err (!%p504_p0)
}
 0x113   :  { %359 = dma.vmem_to_hbm [thread:$0]  %s354_s26, 2048, %s570_s3, [#allocation5], %s523_s15, %s523_s15, %s524_s16  }
 0x114   :  { %520 = dma.done.wait [#allocation5], 2048  }
 0x115   :  { %521 = vsyncadd [#allocation5], 4294965248 }
 0x116   :  { %363 = vsyncpa [#allocation4], 1 }
 0x117   :  { %364 = vsyncpa [#allocation7], 1 }
 0x118   :  { %365 = vsyncpa [#allocation5], 1 }

</bundles_post_ra>
